<compile_context>
chip_gen: v5e
topology: v5e:2x2
jax: 0.10.0
libtpu: 0.0.40
codegen_flags: <defaults>
</compile_context>

<pallas_src>
import math
import functools

import jax
import jax.numpy as jnp
from jax.experimental import pallas as pl
from jax.experimental.pallas import tpu as pltpu

_MIB = 1 << 20
# Conservative per-call VMEM working-set budget: leaves headroom on v7x
# (64 MiB physical per TensorCore); v5e/v6e have 128 MiB so never binding there.
_VMEM_BUDGET = 40 * _MIB


def _round_up(a, b):
    return ((a + b - 1) // b) * b


def _gelu_tanh(x):
    # GELU with tanh approximation, matching torch.nn.GELU(approximate='tanh').
    c = math.sqrt(2.0 / math.pi)
    return 0.5 * x * (1.0 + jnp.tanh(c * (x + 0.044715 * x * x * x)))


def _activation(h, use_relu_square):
    if use_relu_square:
        r = jnp.maximum(h, 0.0)
        return r * r
    return _gelu_tanh(h)


# ---------------------------------------------------------------------------
# Kernel bodies
# ---------------------------------------------------------------------------

def _mlp_kernel_resident(x_ref, w1_ref, b1_ref, w2_ref, b2_ref, o_ref, *,
                         use_relu_square):
    # Grid = (M tiles,). W1/W2 block indices are constant -> DMA'd once, stay
    # resident in VMEM for every row tile.
    # x_ref: (tm, Cp)  w1_ref: (Cp, Hp)  b1_ref: (1, Hp) f32
    # w2_ref: (Hp, Cp) b2_ref: (1, Cp) f32  o_ref: (tm, Cp)
    h = jnp.dot(x_ref[...], w1_ref[...], preferred_element_type=jnp.float32)
    h = h + b1_ref[...]
    a = _activation(h, use_relu_square)
    out = jnp.dot(a.astype(w2_ref.dtype), w2_ref[...],
                  preferred_element_type=jnp.float32)
    o_ref[...] = (out + b2_ref[...]).astype(o_ref.dtype)


def _mlp_kernel_streamed(x_ref, w1_ref, b1_ref, w2_ref, b2_ref, o_ref, acc_ref, *,
                         use_relu_square):
    # Grid = (M tiles, H tiles). The h axis is a reduction for the 2nd matmul.
    # x_ref: (tm, Cp)  w1_ref: (Cp, th) (slab h of host-blocked (nh, Cp, th))
    # b1_ref: (1, th) f32  w2_ref: (th, Cp)  b2_ref: (1, Cp) f32
    # o_ref: (tm, Cp)  acc_ref: f32 (tm, Cp)
    h_idx = pl.program_id(1)

    h = jnp.dot(x_ref[...], w1_ref[...], preferred_element_type=jnp.float32)
    h = h + b1_ref[...]
    a = _activation(h, use_relu_square)
    contrib = jnp.dot(a.astype(w2_ref.dtype), w2_ref[...],
                      preferred_element_type=jnp.float32)

    @pl.when(h_idx == 0)
    def _():
        acc_ref[...] = contrib          # direct assign: skips the zero-fill pass

    @pl.when(h_idx > 0)
    def _():
        acc_ref[...] += contrib

    @pl.when(h_idx == pl.num_programs(1) - 1)
    def _():
        o_ref[...] = (acc_ref[...] + b2_ref[...]).astype(o_ref.dtype)


# ---------------------------------------------------------------------------
# Tile planning
# ---------------------------------------------------------------------------

def _row_tile(M, sub, tm_req, default):
    tm = default if tm_req is None else tm_req
    tm = min(tm, _round_up(M, sub))
    tm = max(sub, _round_up(tm, sub))
    # Keep >=2 row tiles when M allows it so the "parallel" axis can feed both
    # v7x TensorCores (megacore split on v5e/v6e costs nothing).
    if M >= 2 * sub and _round_up(M, sub) <= tm:
        tm = _round_up((M + 1) // 2, sub)
    return tm


def _choose_tiles(M, C, H, cd_size, out_size, sub, tm_req, th_req, force_streamed):
    Cp = _round_up(C, 128)
    Hp0 = _round_up(H, 128)

    # ---- weights-resident fast path: W1/W2 DMA'd once, no h reduction -------
    def resident_bytes(tm):
        return (2 * tm * Cp * cd_size          # x tile, double buffered
                + 4 * Cp * Hp0 * cd_size       # W1 + W2 (conservatively x2 each)
                + 2 * (Hp0 + Cp) * 4           # f32 biases
                + 2 * tm * Cp * out_size       # out tile, double buffered
                + tm * Cp * 4                  # f32 result before output cast
                + 2 * tm * Hp0 * 4             # h and activation intermediates
                + tm * Hp0 * cd_size)          # activation recast for 2nd matmul

    if not force_streamed:
        tm = _row_tile(M, sub, tm_req, 512)
        while resident_bytes(tm) > _VMEM_BUDGET and tm > 256:
            tm = max(256, _round_up(tm // 2, sub))
        if resident_bytes(tm) <= _VMEM_BUDGET:
            return dict(path="resident", tm=tm, th=Hp0, Cp=Cp, Hp=Hp0,
                        vmem_est=resident_bytes(tm))

    # ---- streamed path: weights sliced along H, f32 accumulator --------------
    th_align = 256 if Hp0 >= 256 else 128      # keep the 256^2 MXU full (v6e/v7x)
    th = 1024 if th_req is None else th_req
    th = max(th_align, _round_up(min(th, Hp0), th_align))
    tm = _row_tile(M, sub, tm_req, 1024)       # big rows: amortize weight streaming

    def streamed_bytes(tm_, th_):
        return (2 * tm_ * Cp * cd_size         # x tile
                + 2 * Cp * th_ * cd_size       # W1 slab
                + 2 * th_ * Cp * cd_size       # W2 slab
                + 2 * (th_ + Cp) * 4           # bias slabs
                + 2 * tm_ * Cp * out_size      # out tile
                + tm_ * Cp * 4                 # f32 accumulator scratch
                + 2 * tm_ * th_ * 4            # h and activation intermediates
                + tm_ * th_ * cd_size)         # activation recast

    while streamed_bytes(tm, th) > _VMEM_BUDGET and th > th_align:
        th = max(th_align, _round_up(th // 2, th_align))
    while streamed_bytes(tm, th) > _VMEM_BUDGET and tm > 256:
        tm = max(256, _round_up(tm // 2, sub))
    Hp = _round_up(Hp0, th)
    return dict(path="streamed", tm=tm, th=th, Cp=Cp, Hp=Hp,
                vmem_est=streamed_bytes(tm, th))


# ---------------------------------------------------------------------------
# Wrapper
# ---------------------------------------------------------------------------

def mlp_pallas(x, w1, b1, w2, b2, *, use_relu_square=False, tm=None, th=None,
               cast_to_bf16=True, force_streamed=False, vmem_limit_bytes=None):
    """x: (B, T, C); w1: (C, 4C); b1: (4C,); w2: (4C, C); b2: (C,). Returns (B, T, C)."""
    B, T, C = x.shape
    H = w1.shape[1]
    M = B * T
    out_dtype = x.dtype

    # MXU compute dtype: f32 operands run the MXU in slow multi-pass mode and
    # double the DMA bytes, so matmul operands go in as bf16 (accumulation and
    # all bias/activation math stay f32).
    cd = jnp.bfloat16 if cast_to_bf16 else x.dtype
    cd_size = jnp.dtype(cd).itemsize
    out_size = jnp.dtype(out_dtype).itemsize
    sub = 16 if cd_size == 2 else 8

    plan = _choose_tiles(M, C, H, cd_size, out_size, sub, tm, th, force_streamed)
    tm_, th_, Cp, Hp = plan["tm"], plan["th"], plan["Cp"], plan["Hp"]
    Mp = _round_up(M, tm_)

    # Host-side dtype prep + padding (lane-dense Cp, every tile full).
    x2 = x.reshape(M, C).astype(cd)
    if (Mp, Cp) != (M, C):
        x2 = jnp.pad(x2, ((0, Mp - M), (0, Cp - C)))
    w1p = w1.astype(cd)
    if (Cp, Hp) != (C, H):
        w1p = jnp.pad(w1p, ((0, Cp - C), (0, Hp - H)))
    w2p = w2.astype(cd)
    if (Hp, Cp) != (H, C):
        w2p = jnp.pad(w2p, ((0, Hp - H), (0, Cp - C)))
    b1p = jnp.pad(b1.astype(jnp.float32), ((0, Hp - H),)).reshape(1, Hp)
    b2p = jnp.pad(b2.astype(jnp.float32), ((0, Cp - C),)).reshape(1, Cp)

    if plan["path"] == "resident":
        grid = (Mp // tm_,)
        kernel = functools.partial(_mlp_kernel_resident,
                                   use_relu_square=use_relu_square)
        in_specs = [
            pl.BlockSpec((tm_, Cp), lambda i: (i, 0)),    # x tile
            pl.BlockSpec((Cp, Hp), lambda i: (0, 0)),     # W1 (resident, DMA'd once)
            pl.BlockSpec((1, Hp), lambda i: (0, 0)),      # b1 (f32)
            pl.BlockSpec((Hp, Cp), lambda i: (0, 0)),     # W2 (resident)
            pl.BlockSpec((1, Cp), lambda i: (0, 0)),      # b2 (f32)
        ]
        out_specs = pl.BlockSpec((tm_, Cp), lambda i: (i, 0))
        scratch_shapes = []
        dim_sem = ("parallel",)
        operands = (x2, w1p, b1p, w2p, b2p)
        weight_passes = 1
    else:
        nh = Hp // th_
        # Pre-block W1 to (nh, Cp, th): each h slab becomes one contiguous DMA
        # instead of Cp strided row fragments of th elements.
        w1_blk = w1p.reshape(Cp, nh, th_).transpose(1, 0, 2)
        grid = (Mp // tm_, nh)
        kernel = functools.partial(_mlp_kernel_streamed,
                                   use_relu_square=use_relu_square)
        in_specs = [
            pl.BlockSpec((tm_, Cp), lambda i, h: (i, 0)),          # x tile
            pl.BlockSpec((None, Cp, th_), lambda i, h: (h, 0, 0)),  # W1 slab
            pl.BlockSpec((1, th_), lambda i, h: (0, h)),            # b1 slab
            pl.BlockSpec((th_, Cp), lambda i, h: (h, 0)),           # W2 slab
            pl.BlockSpec((1, Cp), lambda i, h: (0, 0)),             # b2
        ]
        out_specs = pl.BlockSpec((tm_, Cp), lambda i, h: (i, 0))
        scratch_shapes = [pltpu.VMEM((tm_, Cp), jnp.float32)]       # f32 accumulator
        dim_sem = ("parallel", "arbitrary")
        operands = (x2, w1_blk, b1p, w2p, b2p)
        weight_passes = Mp // tm_

    # Truthful cost estimate (weights counted once per M tile when streamed).
    flops = 4 * Mp * Cp * Hp
    transcend = 0 if use_relu_square else Mp * Hp
    bytes_accessed = (Mp * Cp * cd_size
                      + weight_passes * 2 * Cp * Hp * cd_size
                      + (Hp + Cp) * 4
                      + Mp * Cp * out_size)
    cost = pl.CostEstimate(flops=int(flops), transcendentals=int(transcend),
                           bytes_accessed=int(bytes_accessed))

    if vmem_limit_bytes is None:
        # Never below the 32 MiB scoped default (covers v5e's 16 MiB default),
        # never above ~56 MiB (v7x has only 64 MiB physical VMEM per TC).
        vmem_limit_bytes = int(min(56 * _MIB,
                                   max(32 * _MIB,
                                       plan["vmem_est"] * 3 // 2 + 2 * _MIB)))

    out2 = pl.pallas_call(
        kernel,
        out_shape=jax.ShapeDtypeStruct((Mp, Cp), out_dtype),
        grid_spec=pltpu.PrefetchScalarGridSpec(
            num_scalar_prefetch=0,
            grid=grid,
            in_specs=in_specs,
            out_specs=out_specs,
            scratch_shapes=scratch_shapes,
        ),
        compiler_params=pltpu.CompilerParams(
            dimension_semantics=dim_sem,
            vmem_limit_bytes=vmem_limit_bytes,
        ),
        cost_estimate=cost,
    )(*operands)

    return out2[:M, :C].reshape(B, T, C)


# ---------------------------------------------------------------------------
# Reference + test harness
# ---------------------------------------------------------------------------

def mlp_ref(x, w1, b1, w2, b2, *, use_relu_square=False,
            compute_dtype=jnp.bfloat16):
    # Mirrors the kernel's numerics: bf16 matmul operands, f32 accumulation,
    # f32 bias/activation math.
    cd = compute_dtype
    h = jnp.dot(x.astype(cd), w1.astype(cd),
                preferred_element_type=jnp.float32) + b1.astype(jnp.float32)
    a = jnp.square(jnp.maximum(h, 0.0)) if use_relu_square else _gelu_tanh(h)
    out = jnp.dot(a.astype(cd), w2.astype(cd),
                  preferred_element_type=jnp.float32) + b2.astype(jnp.float32)
    return out.astype(x.dtype)


def _make_inputs(key, B, T, C):
    H = 4 * C
    kx, k1, kb1, k2, kb2 = jax.random.split(key, 5)
    x = jax.random.normal(kx, (B, T, C), dtype=jnp.float32)
    bound1 = 1.0 / math.sqrt(C)
    w1 = jax.random.uniform(k1, (C, H), jnp.float32, -bound1, bound1)   # c_fc.weight.T
    b1 = jax.random.uniform(kb1, (H,), jnp.float32, -bound1, bound1)    # c_fc.bias
    bound2 = 1.0 / math.sqrt(H)
    w2 = jax.random.uniform(k2, (H, C), jnp.float32, -bound2, bound2)   # c_proj.weight.T
    b2 = jax.random.uniform(kb2, (C,), jnp.float32, -bound2, bound2)    # c_proj.bias
    return x, w1, b1, w2, b2


if __name__ == "__main__":
    key = jax.random.PRNGKey(0)
    k_a, k_b = jax.random.split(key)

    # Case 1: GELU path, small C (exercises C->128 lane padding) -> auto picks
    # the weights-resident path.
    x, w1, b1, w2, b2 = _make_inputs(k_a, B=2, T=8, C=32)
    out = jax.block_until_ready(mlp_pallas(x, w1, b1, w2, b2, use_relu_square=False))
    ref = mlp_ref(x, w1, b1, w2, b2, use_relu_square=False)
    assert out.shape == x.shape
    assert jnp.allclose(out, ref, atol=5e-3, rtol=5e-3), "GELU/resident path mismatch"

    # Case 2: relu()^2 path, forced streamed with 2 hidden (h) tiles — exercises
    # the f32 accumulator, first-step assign and last-step bias+store, plus M
    # padding (M=24 -> 32).
    x, w1, b1, w2, b2 = _make_inputs(k_b, B=2, T=12, C=128)
    out = jax.block_until_ready(
        mlp_pallas(x, w1, b1, w2, b2, use_relu_square=True,
                   force_streamed=True, th=256))
    ref = mlp_ref(x, w1, b1, w2, b2, use_relu_square=True)
    assert out.shape == x.shape
    assert jnp.allclose(out, ref, atol=5e-3, rtol=5e-3), "relu^2/streamed path mismatch"

    print("KERNEL_OK")
</pallas_src>

<mosaic_0001>
module attributes {stable_mosaic.version = 11 : i64} {
  func.func @_mlp_kernel_resident(%arg0: i32, %arg1: memref<16x128xbf16, #tpu.memory_space<vmem>>, %arg2: memref<128x128xbf16, #tpu.memory_space<vmem>>, %arg3: memref<1x128xf32, #tpu.memory_space<vmem>>, %arg4: memref<128x128xbf16, #tpu.memory_space<vmem>>, %arg5: memref<1x128xf32, #tpu.memory_space<vmem>>, %arg6: memref<16x128xf32, #tpu.memory_space<vmem>>) attributes {dimension_semantics = [#tpu.dimension_semantics<parallel>], iteration_bounds = array<i64: 1>, scalar_prefetch = 0 : i64, scratch_operands = 0 : i64, tpu.core_type = #tpu.core_type<tc>, window_params = [{transform_indices = @transform_0, window_bounds = array<i64: 16, 128>}, {pipeline_mode = #tpu.pipeline_mode<synchronous>, transform_indices = @transform_1, window_bounds = array<i64: 128, 128>}, {pipeline_mode = #tpu.pipeline_mode<synchronous>, transform_indices = @transform_2, window_bounds = array<i64: 1, 128>}, {pipeline_mode = #tpu.pipeline_mode<synchronous>, transform_indices = @transform_3, window_bounds = array<i64: 128, 128>}, {pipeline_mode = #tpu.pipeline_mode<synchronous>, transform_indices = @transform_4, window_bounds = array<i64: 1, 128>}, {transform_indices = @transform_5, window_bounds = array<i64: 16, 128>}]} {
    %c0 = arith.constant 0 : index
    %c0_0 = arith.constant 0 : index
    %0 = vector.load %arg1[%c0, %c0_0] : memref<16x128xbf16, #tpu.memory_space<vmem>>, vector<16x128xbf16>
    %c0_1 = arith.constant 0 : index
    %c0_2 = arith.constant 0 : index
    %1 = vector.load %arg2[%c0_1, %c0_2] : memref<128x128xbf16, #tpu.memory_space<vmem>>, vector<128x128xbf16>
    %cst = arith.constant dense<0.000000e+00> : vector<16x128xf32>
    %2 = tpu.matmul %0, %1, %cst {dimension_numbers = #tpu.dot_dimension_numbers<[1], [0], [0], [1], [0, 0, 1, 1], [], []>} : vector<16x128xbf16>, vector<128x128xbf16>, vector<16x128xf32> -> vector<16x128xf32>
    %c0_3 = arith.constant 0 : index
    %c0_4 = arith.constant 0 : index
    %3 = vector.load %arg3[%c0_3, %c0_4] : memref<1x128xf32, #tpu.memory_space<vmem>>, vector<1x128xf32>
    %4 = vector.broadcast %3 : vector<1x128xf32> to vector<16x128xf32>
    %5 = arith.addf %2, %4 : vector<16x128xf32>
    %cst_5 = arith.constant 5.000000e-01 : f32
    %6 = vector.broadcast %cst_5 : f32 to vector<16x128xf32>
    %7 = arith.mulf %6, %5 : vector<16x128xf32>
    %cst_6 = arith.constant 4.471500e-02 : f32
    %8 = vector.broadcast %cst_6 : f32 to vector<16x128xf32>
    %9 = arith.mulf %8, %5 : vector<16x128xf32>
    %10 = arith.mulf %9, %5 : vector<16x128xf32>
    %11 = arith.mulf %10, %5 : vector<16x128xf32>
    %12 = arith.addf %5, %11 : vector<16x128xf32>
    %cst_7 = arith.constant 0.797884583 : f32
    %13 = vector.broadcast %cst_7 : f32 to vector<16x128xf32>
    %14 = arith.mulf %13, %12 : vector<16x128xf32>
    %15 = math.tanh %14 : vector<16x128xf32>
    %cst_8 = arith.constant 1.000000e+00 : f32
    %16 = vector.broadcast %cst_8 : f32 to vector<16x128xf32>
    %17 = arith.addf %16, %15 : vector<16x128xf32>
    %18 = arith.mulf %7, %17 : vector<16x128xf32>
    %19 = arith.truncf %18 : vector<16x128xf32> to vector<16x128xbf16>
    %c0_9 = arith.constant 0 : index
    %c0_10 = arith.constant 0 : index
    %20 = vector.load %arg4[%c0_9, %c0_10] : memref<128x128xbf16, #tpu.memory_space<vmem>>, vector<128x128xbf16>
    %cst_11 = arith.constant dense<0.000000e+00> : vector<16x128xf32>
    %21 = tpu.matmul %19, %20, %cst_11 {dimension_numbers = #tpu.dot_dimension_numbers<[1], [0], [0], [1], [0, 0, 1, 1], [], []>} : vector<16x128xbf16>, vector<128x128xbf16>, vector<16x128xf32> -> vector<16x128xf32>
    %c0_12 = arith.constant 0 : index
    %c0_13 = arith.constant 0 : index
    %22 = vector.load %arg5[%c0_12, %c0_13] : memref<1x128xf32, #tpu.memory_space<vmem>>, vector<1x128xf32>
    %23 = vector.broadcast %22 : vector<1x128xf32> to vector<16x128xf32>
    %24 = arith.addf %21, %23 : vector<16x128xf32>
    %c0_14 = arith.constant 0 : index
    %c0_15 = arith.constant 0 : index
    %25 = vector.load %arg6[%c0_14, %c0_15] : memref<16x128xf32, #tpu.memory_space<vmem>>, vector<16x128xf32>
    tpu.vector_store %arg6[%c0_14, %c0_15], %24 {strides = array<i32>} : memref<16x128xf32, #tpu.memory_space<vmem>>, vector<16x128xf32>,
    return
  }
  func.func @transform_0(%arg0: i32) -> (i32, i32) {
    %c0_i32 = arith.constant 0 : i32
    %c0_i32_0 = arith.constant 0 : i32
    return %arg0, %c0_i32 : i32, i32
  }
  func.func @transform_1(%arg0: i32) -> (i32, i32) {
    %c0_i32 = arith.constant 0 : i32
    %c0_i32_0 = arith.constant 0 : i32
    %c0_i32_1 = arith.constant 0 : i32
    return %c0_i32, %c0_i32_0 : i32, i32
  }
  func.func @transform_2(%arg0: i32) -> (i32, i32) {
    %c0_i32 = arith.constant 0 : i32
    %c0_i32_0 = arith.constant 0 : i32
    %c0_i32_1 = arith.constant 0 : i32
    return %c0_i32, %c0_i32_0 : i32, i32
  }
  func.func @transform_3(%arg0: i32) -> (i32, i32) {
    %c0_i32 = arith.constant 0 : i32
    %c0_i32_0 = arith.constant 0 : i32
    %c0_i32_1 = arith.constant 0 : i32
    return %c0_i32, %c0_i32_0 : i32, i32
  }
  func.func @transform_4(%arg0: i32) -> (i32, i32) {
    %c0_i32 = arith.constant 0 : i32
    %c0_i32_0 = arith.constant 0 : i32
    %c0_i32_1 = arith.constant 0 : i32
    return %c0_i32, %c0_i32_0 : i32, i32
  }
  func.func @transform_5(%arg0: i32) -> (i32, i32) {
    %c0_i32 = arith.constant 0 : i32
    %c0_i32_0 = arith.constant 0 : i32
    return %arg0, %c0_i32 : i32, i32
  }
}

</mosaic_0001>

<bundles_post_ra>
// kernel: tpu_custom_call.1
= control target key start
LH: loop header
LB: loop body
LE: loop exit
PB: predicated region body
PF: predicated region fallthrough
CT: control target
= control target key end

     0   :  { %10 = vsyncpa [#allocation3], 0  ;;  %s538_s0 = inlined_call_operand.hbm [shape: bf16[16,128], index: 0, kind: input, shape index: {}]   ;;  %s539_s1 = inlined_call_operand.hbm [shape: bf16[128,128], index: 1, kind: input, shape index: {}]   ;;  %s540_s2 = inlined_call_operand.vmem [shape: f32[1,128], index: 2, kind: input, shape index: {}]   ;;  %s541_s3 = inlined_call_operand.hbm [shape: bf16[128,128], index: 3, kind: input, shape index: {}]   ;;  %s542_s4 = inlined_call_operand.vmem [shape: f32[1,128], index: 4, kind: input, shape index: {}]   ;;  %s543_s5 = inlined_call_operand.hbm [shape: f32[16,128], index: 5, kind: output, shape index: {}]  }
   0x1   :  { %11 = vsyncpa [#allocation6], 0 }
   0x2   :  { %12 = vsyncpa [#allocation4], 0  ;;  %s30_s20 = sshll.u32 %s539_s1, 4  ;;  %s482_s21 = smov [#allocation5]   ;;  %s31_s20 = int_to_ptr.hbm [resolvable:$true] %s30_s20 }
   0x3   :  { %s32_s22 = sshll.u32 %s482_s21, 4  ;;  %s17_s25 = sshll.u32 %s538_s0, 4  ;;  %s33_s22 = int_to_ptr.vmem [resolvable:$true] %s32_s22  ;;  %s18_s25 = int_to_ptr.hbm [resolvable:$true] %s17_s25 }
   0x4   :  { %s483_s26 = smov 64   ;;  %s484_s27 = smov 4  }
   0x5   :  { %38 = dma.hbm_to_vmem [thread:$0]  %s31_s20, 1024, %s33_s22, [#allocation6], %s483_s26, %s483_s26, %s484_s27  }
   0x6   :  { %s485_s28 = smov [#allocation2]   ;;  %s45_s7 = sshll.u32 %s541_s3, 4  ;;  %s46_s7 = int_to_ptr.hbm [resolvable:$true] %s45_s7 }
   0x7   :  { %s19_s29 = sshll.u32 %s485_s28, 4  ;;  %s486_s1 = smov [#allocation7]   ;;  %s20_s29 = int_to_ptr.vmem [resolvable:$true] %s19_s29 }
   0x8   :  { %25 = dma.hbm_to_vmem [thread:$0]  %s18_s25, 128, %s20_s29, [#allocation3], %s483_s26, %s483_s26, %s484_s27  }
   0x9   :  { %s47_s8 = sshll.u32 %s486_s1, 4  ;;  %s48_s8 = int_to_ptr.vmem [resolvable:$true] %s47_s8 }
   0xa   :  { %53 = dma.hbm_to_vmem [thread:$0]  %s46_s7, 1024, %s48_s8, [#allocation6], %s483_s26, %s483_s26, %s484_s27  }
   0xb   :  { %476 = dma.done.wait [#allocation3], 128  }
   0xc   :  { %477 = vsyncadd [#allocation3], 4294967168 }
   0xd   :  { %478 = dma.done.wait [#allocation6], 2048  }
   0xe   :  { %479 = vsyncadd [#allocation6], 4294965248  ;;  %v357_v0 = vld [vmem:[#allocation5 + $0x38] sm:$0xff]  ;;  %v356_v1 = vld [vmem:[#allocation5 + $0x30] sm:$0xff]  ;;  %s487_s10 = smov [#allocation8]   ;;  %s267_s14 = sshll.u32 %s543_s5, 4  ;;  %s268_s14 = int_to_ptr.hbm [resolvable:$true] %s267_s14 }
   0xf   :  { %144 = vmatpush.bf16.msra.mxu0 %v357_v0  ;;  %v355_v2 = vld [vmem:[#allocation5 + $0x28] sm:$0xff]  ;;  %v354_v3 = vld [vmem:[#allocation5 + $0x20] sm:$0xff]  ;;  %v353_v4 = vld [vmem:[#allocation5 + $0x18] sm:$0xff]  ;;  %s265_s11 = sshll.u32 %s487_s10, 4  ;;  %s488_s15 = smov 128   ;;  %s266_s11 = int_to_ptr.vmem [resolvable:$true] %s265_s11 }
  0x10   :  { %v352_v5 = vld [vmem:[#allocation5 + $0x10] sm:$0xff]  ;;  %v351_v6 = vld [vmem:[#allocation5 + $0x8] sm:$0xff]  ;;  %v350_v7 = vld [vmem:[#allocation5] sm:$0xff]  ;;  %s489_s16 = smov 8  }
  0x11   :  { %v349_v8 = vld [vmem:[#allocation2] sm:$0xff]  ;;  %v364_v10 = vld [vmem:[#allocation7 + $0x30] sm:$0xff]  ;;  %v363_v11 = vld [vmem:[#allocation7 + $0x28] sm:$0xff] }
  0x12   :  { %v365_v9 = vld [vmem:[#allocation7 + $0x38] sm:$0xff]  ;;  %v362_v12 = vld [vmem:[#allocation7 + $0x20] sm:$0xff]  ;;  %v360_v14 = vld [vmem:[#allocation7 + $0x10] sm:$0xff] }
  0x13   :  { %145 = vmatpush.bf16.msra.mxu0 %v356_v1  ;;  %245 = vmatpush.bf16.msra.mxu1 %v365_v9  ;;  %v361_v13 = vld [vmem:[#allocation7 + $0x18] sm:$0xff]  ;;  %v359_v15 = vld [vmem:[#allocation7 + $0x8] sm:$0xff]  ;;  %v358_v16 = vld [vmem:[#allocation7] sm:$0xff] }
  0x14   :  { %v374_v17 = vld [vmem:[%s540_s2] ss:$0 sm:$0xff] }
  0x15   :  { %v375_v41 = vld [vmem:[%s542_s4] ss:$0 sm:$0xff] }
  0x17   :  { %146 = vmatpush.bf16.msra.mxu0 %v355_v2  ;;  %246 = vmatpush.bf16.msra.mxu1 %v364_v10 }
  0x1b   :  { %147 = vmatpush.bf16.msra.mxu0 %v354_v3  ;;  %247 = vmatpush.bf16.msra.mxu1 %v363_v11 }
  0x1f   :  { %148 = vmatpush.bf16.msra.mxu0 %v353_v4  ;;  %248 = vmatpush.bf16.msra.mxu1 %v362_v12 }
  0x23   :  { %149 = vmatpush.bf16.msra.mxu0 %v352_v5  ;;  %249 = vmatpush.bf16.msra.mxu1 %v361_v13 }
  0x27   :  { %150 = vmatpush.bf16.msra.mxu0 %v351_v6  ;;  %250 = vmatpush.bf16.msra.mxu1 %v360_v14 }
  0x2b   :  { %151 = vmatpush.bf16.msra.mxu0 %v350_v7  ;;  %251 = vmatpush.bf16.msra.mxu1 %v359_v15 }
  0x2e   :  { %152 = vmatmul.bf16.vlgmr.msra.gmra.mxu0 %v349_v8 }
  0x2f   :  { %252 = vmatpush.bf16.msra.mxu1 %v358_v16 }
  0xab   :  { %v153_v18 = vpop.f32.mrf.mxu0 }
  0xac   :  { %v154_v19 = vadd.f32 %v374_v17, %v153_v18 }
  0xae   :  { %v160_v20 = vmul.f32 0.044715, %v154_v19  ;;  %v158_v35 = vmul.f32 0.5, %v154_v19 }
  0xb0   :  { %v162_v21 = vmul.f32 %v160_v20, %v154_v19 }
  0xb2   :  { %v164_v22 = vmul.f32 %v162_v21, %v154_v19 }
  0xb3   :  { %v155_v23 = vpop.f32.mrf.mxu0 }
  0xb4   :  { %v156_v24 = vadd.f32 %v374_v17, %v155_v23  ;;  %v166_v25 = vadd.f32 %v164_v22, %v154_v19 }
  0xb6   :  { %v161_v26 = vmul.f32 0.044715, %v156_v24  ;;  %v168_v28 = vmul.f32 0.7978846, %v166_v25  ;;  %v159_v36 = vmul.f32 0.5, %v156_v24 }
  0xb8   :  { %v163_v27 = vmul.f32 %v161_v26, %v156_v24  ;;  %376 = vtanh.f32 %v168_v28 }
  0xba   :  { %v165_v29 = vmul.f32 %v163_v27, %v156_v24 }
  0xbc   :  { %v167_v30 = vadd.f32 %v165_v29, %v156_v24 }
  0xbe   :  { %v169_v31 = vmul.f32 0.7978846, %v167_v30  ;;  %v377_v32 = vpop.eup %376 }
  0xbf   :  { %v172_v33 = vadd.f32 1.0, %v377_v32 }
  0xc0   :  { %378 = vtanh.f32 %v169_v31 }
  0xc1   :  { %v174_v38 = vmul.f32 %v172_v33, %v158_v35 }
  0xc6   :  { %v379_v34 = vpop.eup %378 }
  0xc7   :  { %v173_v37 = vadd.f32 1.0, %v379_v34 }
  0xc9   :  { %v175_v39 = vmul.f32 %v173_v37, %v159_v36 }
  0xcb   :  { %v176_v40 = vpack.c.bf16 %v175_v39, %v174_v38 }
  0xcd   :  { %253 = vmatmul.bf16.vlgmr.msra.gmra.mxu1 %v176_v40 }
 0x14a   :  { %v254_v42 = vpop.f32.mrf.mxu1 }
 0x14b   :  { %v255_v43 = vadd.f32 %v375_v41, %v254_v42 }
 0x14d   :  { %259 = vst [vmem:[#allocation8] sm:$0xff] %v255_v43 }
 0x152   :  { %v256_v44 = vpop.f32.mrf.mxu1 }
 0x153   :  { %v257_v45 = vadd.f32 %v375_v41, %v256_v44 }
 0x155   :  { %260 = vst [vmem:[#allocation8 + $0x8] sm:$0xff] %v257_v45 }
 0x156   :  { %273 = dma.vmem_to_hbm [thread:$0]  %s266_s11, 256, %s268_s14, [#allocation4], %s488_s15, %s488_s15, %s489_s16  }
 0x157   :  { %480 = dma.done.wait [#allocation4], 256  }
 0x158   :  { %481 = vsyncadd [#allocation4], 4294967040 }
 0x159   :  { %278 = vsyncpa [#allocation3], 1 }
 0x15a   :  { %279 = vsyncpa [#allocation6], 1 }
 0x15b   :  { %280 = vsyncpa [#allocation4], 1 }

</bundles_post_ra>
